<compile_context>
chip_gen: v5e
topology: v5e:2x2
jax: 0.10.0
libtpu: 0.0.40
codegen_flags: <defaults>
</compile_context>

<pallas_src>
import jax
import jax.numpy as jnp
import numpy as np
from jax.experimental import pallas as pl
from jax.experimental.pallas import tpu as pltpu


# ----------------------------- Pallas kernel ------------------------------- #
def _aspects_head_ce_kernel(hid_ref, onehot_ref, wd_ref, bd_ref, wo_ref, bo_ref,
                            logits_ref, loss_ref):
    hid = hid_ref[...]                      # (B, H)   pooled decoder state [:, 1]
    dn = (((1,), (1,)), ((), ()))           # contract H-on-H == x @ W^T, no transpose

    # BartClassificationHead: dense -> tanh -> out_proj  (dropout = identity, eval)
    x = jax.lax.dot_general(hid, wd_ref[...], dn,
                            preferred_element_type=jnp.float32) + bd_ref[...]
    x = jnp.tanh(x)
    logits = jax.lax.dot_general(x, wo_ref[...], dn,
                                 preferred_element_type=jnp.float32) + bo_ref[...]
    # Padded classes already carry a -1e30 bias (folded into bo_ref in the
    # wrapper), so this is a single lane-dense full-width store.
    logits_ref[...] = logits                # (B, Cp)

    # CrossEntropyLoss (mean over batch), numerically-stable logsumexp.
    m = jnp.max(logits, axis=-1, keepdims=True)                       # (B, 1)
    lse = m + jnp.log(jnp.sum(jnp.exp(logits - m), axis=-1, keepdims=True))
    correct = jnp.sum(logits * onehot_ref[...], axis=-1, keepdims=True)
    per_sample = lse - correct                                        # (B, 1)
    inv_b = jnp.float32(1.0 / per_sample.shape[0])
    loss_ref[...] = jnp.sum(per_sample, axis=0, keepdims=True) * inv_b  # (1, 1)


def _aspects_num_pallas(pooled, onehot, wd, bd2, wo_pad, bo_pad):
    B, H = pooled.shape
    Cp = onehot.shape[1]
    return pl.pallas_call(
        _aspects_head_ce_kernel,
        out_shape=(jax.ShapeDtypeStruct((B, Cp), jnp.float32),   # padded logits
                   jax.ShapeDtypeStruct((1, 1), jnp.float32)),   # CE loss
        grid=(1,),
        in_specs=[
            pl.BlockSpec((B, H),  lambda i: (0, 0)),    # pooled hidden [:, 1]
            pl.BlockSpec((B, Cp), lambda i: (0, 0)),    # label one-hot
            pl.BlockSpec((H, H),  lambda i: (0, 0)),    # dense weight (out, in)
            pl.BlockSpec((1, H),  lambda i: (0, 0)),    # dense bias
            pl.BlockSpec((Cp, H), lambda i: (0, 0)),    # out_proj weight (padded)
            pl.BlockSpec((1, Cp), lambda i: (0, 0)),    # out_proj bias (+ pad mask)
        ],
        out_specs=(
            pl.BlockSpec((B, Cp), lambda i: (0, 0)),
            pl.BlockSpec((1, 1),  lambda i: (0, 0)),
        ),
        compiler_params=pltpu.CompilerParams(
            dimension_semantics=("arbitrary",)),
    )(pooled, onehot, wd, bd2, wo_pad, bo_pad)


# ------------------------------ JAX wrapper --------------------------------- #
def multimodal_bart_decoder_aspects_num_forward(
        aspects_num_labels, encoder_outputs, attention_mask,
        aspects_num_decoder_input_ids, embed_weight, wd, bd, wo, bo,
        *, max_aspects_nums):
    """Eval-mode forward: returns (aspects_num_loss, predict_aspects_num_logits)."""
    # TODO(synk): the injected BART `decoder` (self/cross-attention over
    # encoder_outputs with attention_mask) is an external submodule; stubbed
    # here as an embedding lookup producing the decoder hidden states.
    del encoder_outputs, attention_mask
    hidden_state = embed_weight[aspects_num_decoder_input_ids]        # (B, L, H)

    # decoder_outputs[0][:, 1] — slice in the wrapper so the kernel only DMAs (B, H).
    pooled = hidden_state[:, 1, :]                                    # (B, H)

    B, H = pooled.shape
    C = max_aspects_nums
    Cp = max(128, ((C + 127) // 128) * 128)                           # lane-dense class dim

    # Pad out_proj to a lane-dense slab; fold the "invalid class" mask into the
    # bias so padded logits come out as -1e30 with no in-kernel compare/where.
    wo_pad = jnp.zeros((Cp, H), jnp.float32).at[:C].set(wo)
    bo_pad = jnp.full((1, Cp), -1e30, jnp.float32).at[0, :C].set(bo)
    bd2 = bd.reshape(1, H)

    labels = jnp.asarray(aspects_num_labels, dtype=jnp.int32)         # (B,)
    onehot = jax.nn.one_hot(labels, Cp, dtype=jnp.float32)            # (B, Cp)

    logits_pad, loss = _aspects_num_pallas(pooled, onehot, wd, bd2, wo_pad, bo_pad)
    return loss[0, 0], logits_pad[:, :C]


# ------------------------------ reference ----------------------------------- #
def _reference(pooled, wd, bd, wo, bo, labels):
    x = jnp.tanh(pooled @ wd.T + bd)
    logits = x @ wo.T + bo
    logp = jax.nn.log_softmax(logits, axis=-1)
    nll = -jnp.take_along_axis(logp, labels[:, None], axis=1)[:, 0]
    return logits, jnp.mean(nll)


# -------------------------------- main --------------------------------------- #
if __name__ == "__main__":
    key = jax.random.PRNGKey(0)

    # small, self-consistent config
    B, L, H = 2, 8, 32          # batch, decoder seq len, d_model
    N_enc = 16                  # encoder seq len
    vocab = 64
    max_aspects_nums = 5        # classification head width

    keys = jax.random.split(key, 8)
    embed_weight = jax.random.normal(keys[0], (vocab, H), dtype=jnp.float32) * 0.02
    wd = jax.random.normal(keys[1], (H, H), dtype=jnp.float32) * 0.05   # dense (out,in)
    bd = jax.random.normal(keys[2], (H,), dtype=jnp.float32) * 0.01
    wo = jax.random.normal(keys[3], (max_aspects_nums, H), dtype=jnp.float32) * 0.05
    bo = jax.random.normal(keys[4], (max_aspects_nums,), dtype=jnp.float32) * 0.01

    encoder_outputs = jax.random.normal(keys[5], (B, N_enc, H), dtype=jnp.float32)
    attention_mask = jnp.ones((B, N_enc), dtype=jnp.int32)
    aspects_num_decoder_input_ids = jax.random.randint(
        keys[6], (B, L), 0, vocab, dtype=jnp.int32)
    aspects_num_labels = [2, 4]                                       # in [0, 5)

    loss, logits = multimodal_bart_decoder_aspects_num_forward(
        aspects_num_labels, encoder_outputs, attention_mask,
        aspects_num_decoder_input_ids, embed_weight, wd, bd, wo, bo,
        max_aspects_nums=max_aspects_nums)

    loss = jax.block_until_ready(loss)
    logits = jax.block_until_ready(logits)

    # reference (plain JAX) for correctness
    pooled_ref = embed_weight[aspects_num_decoder_input_ids][:, 1, :]
    labels_ref = jnp.asarray(aspects_num_labels, dtype=jnp.int32)
    ref_logits, ref_loss = _reference(pooled_ref, wd, bd, wo, bo, labels_ref)

    np.testing.assert_allclose(np.asarray(logits), np.asarray(ref_logits),
                               rtol=1e-4, atol=1e-5)
    np.testing.assert_allclose(float(loss), float(ref_loss),
                               rtol=1e-4, atol=1e-5)

    assert logits.shape == (B, max_aspects_nums)
    assert loss.shape == ()
    print("KERNEL_OK")
</pallas_src>

<mosaic_0001>
module attributes {stable_mosaic.version = 11 : i64} {
  func.func @_aspects_head_ce_kernel(%arg0: i32, %arg1: memref<2x32xf32, #tpu.memory_space<vmem>>, %arg2: memref<2x128xf32, #tpu.memory_space<vmem>>, %arg3: memref<32x32xf32, #tpu.memory_space<vmem>>, %arg4: memref<1x32xf32, #tpu.memory_space<vmem>>, %arg5: memref<128x32xf32, #tpu.memory_space<vmem>>, %arg6: memref<1x128xf32, #tpu.memory_space<vmem>>, %arg7: memref<2x128xf32, #tpu.memory_space<vmem>>, %arg8: memref<1x1xf32, #tpu.memory_space<vmem>>) attributes {dimension_semantics = [#tpu.dimension_semantics<arbitrary>], iteration_bounds = array<i64: 1>, scalar_prefetch = 0 : i64, scratch_operands = 0 : i64, tpu.core_type = #tpu.core_type<tc>, window_params = [{pipeline_mode = #tpu.pipeline_mode<synchronous>, transform_indices = @transform_0, window_bounds = array<i64: 2, 32>}, {pipeline_mode = #tpu.pipeline_mode<synchronous>, transform_indices = @transform_1, window_bounds = array<i64: 2, 128>}, {pipeline_mode = #tpu.pipeline_mode<synchronous>, transform_indices = @transform_2, window_bounds = array<i64: 32, 32>}, {pipeline_mode = #tpu.pipeline_mode<synchronous>, transform_indices = @transform_3, window_bounds = array<i64: 1, 32>}, {pipeline_mode = #tpu.pipeline_mode<synchronous>, transform_indices = @transform_4, window_bounds = array<i64: 128, 32>}, {pipeline_mode = #tpu.pipeline_mode<synchronous>, transform_indices = @transform_5, window_bounds = array<i64: 1, 128>}, {pipeline_mode = #tpu.pipeline_mode<synchronous>, transform_indices = @transform_6, window_bounds = array<i64: 2, 128>}, {pipeline_mode = #tpu.pipeline_mode<synchronous>, transform_indices = @transform_7, window_bounds = array<i64: 1, 1>}]} {
    %c0 = arith.constant 0 : index
    %c0_0 = arith.constant 0 : index
    %0 = vector.load %arg1[%c0, %c0_0] : memref<2x32xf32, #tpu.memory_space<vmem>>, vector<2x32xf32>
    %c0_1 = arith.constant 0 : index
    %c0_2 = arith.constant 0 : index
    %1 = vector.load %arg3[%c0_1, %c0_2] : memref<32x32xf32, #tpu.memory_space<vmem>>, vector<32x32xf32>
    %cst = arith.constant dense<0.000000e+00> : vector<2x32xf32>
    %2 = tpu.matmul %0, %1, %cst {dimension_numbers = #tpu.dot_dimension_numbers<[1], [1], [0], [0], [0, 0, 1, 0], [], []>} : vector<2x32xf32>, vector<32x32xf32>, vector<2x32xf32> -> vector<2x32xf32>
    %c0_3 = arith.constant 0 : index
    %c0_4 = arith.constant 0 : index
    %3 = vector.load %arg4[%c0_3, %c0_4] : memref<1x32xf32, #tpu.memory_space<vmem>>, vector<1x32xf32>
    %4 = vector.broadcast %3 : vector<1x32xf32> to vector<2x32xf32>
    %5 = arith.addf %2, %4 : vector<2x32xf32>
    %6 = math.tanh %5 : vector<2x32xf32>
    %c0_5 = arith.constant 0 : index
    %c0_6 = arith.constant 0 : index
    %7 = vector.load %arg5[%c0_5, %c0_6] : memref<128x32xf32, #tpu.memory_space<vmem>>, vector<128x32xf32>
    %cst_7 = arith.constant dense<0.000000e+00> : vector<2x128xf32>
    %8 = tpu.matmul %6, %7, %cst_7 {dimension_numbers = #tpu.dot_dimension_numbers<[1], [1], [0], [0], [0, 0, 1, 0], [], []>} : vector<2x32xf32>, vector<128x32xf32>, vector<2x128xf32> -> vector<2x128xf32>
    %c0_8 = arith.constant 0 : index
    %c0_9 = arith.constant 0 : index
    %9 = vector.load %arg6[%c0_8, %c0_9] : memref<1x128xf32, #tpu.memory_space<vmem>>, vector<1x128xf32>
    %10 = vector.broadcast %9 : vector<1x128xf32> to vector<2x128xf32>
    %11 = arith.addf %8, %10 : vector<2x128xf32>
    %c0_10 = arith.constant 0 : index
    %c0_11 = arith.constant 0 : index
    %12 = vector.load %arg7[%c0_10, %c0_11] : memref<2x128xf32, #tpu.memory_space<vmem>>, vector<2x128xf32>
    tpu.vector_store %arg7[%c0_10, %c0_11], %11 {strides = array<i32>} : memref<2x128xf32, #tpu.memory_space<vmem>>, vector<2x128xf32>,
    %cst_12 = arith.constant dense<0xFF800000> : vector<2xf32>
    %13 = vector.multi_reduction <maximumf>, %11, %cst_12 [1] : vector<2x128xf32> to vector<2xf32>
    %14 = vector.shape_cast %13 : vector<2xf32> to vector<2x1xf32>
    %15 = vector.broadcast %14 : vector<2x1xf32> to vector<2x128xf32>
    %16 = arith.subf %11, %15 : vector<2x128xf32>
    %17 = math.exp %16 : vector<2x128xf32>
    %cst_13 = arith.constant dense<0.000000e+00> : vector<2xf32>
    %18 = vector.multi_reduction <add>, %17, %cst_13 [1] : vector<2x128xf32> to vector<2xf32>
    %19 = vector.shape_cast %18 : vector<2xf32> to vector<2x1xf32>
    %20 = math.log %19 : vector<2x1xf32>
    %21 = arith.addf %14, %20 : vector<2x1xf32>
    %c0_14 = arith.constant 0 : index
    %c0_15 = arith.constant 0 : index
    %22 = vector.load %arg2[%c0_14, %c0_15] : memref<2x128xf32, #tpu.memory_space<vmem>>, vector<2x128xf32>
    %23 = arith.mulf %11, %22 : vector<2x128xf32>
    %cst_16 = arith.constant dense<0.000000e+00> : vector<2xf32>
    %24 = vector.multi_reduction <add>, %23, %cst_16 [1] : vector<2x128xf32> to vector<2xf32>
    %25 = vector.shape_cast %24 : vector<2xf32> to vector<2x1xf32>
    %26 = arith.subf %21, %25 : vector<2x1xf32>
    %cst_17 = arith.constant dense<0.000000e+00> : vector<1xf32>
    %27 = vector.multi_reduction <add>, %26, %cst_17 [0] : vector<2x1xf32> to vector<1xf32>
    %28 = vector.shape_cast %27 : vector<1xf32> to vector<1x1xf32>
    %cst_18 = arith.constant 5.000000e-01 : f32
    %29 = vector.broadcast %cst_18 : f32 to vector<1x1xf32>
    %30 = arith.mulf %28, %29 : vector<1x1xf32>
    %c0_19 = arith.constant 0 : index
    %c0_20 = arith.constant 0 : index
    %31 = vector.load %arg8[%c0_19, %c0_20] : memref<1x1xf32, #tpu.memory_space<vmem>>, vector<1x1xf32>
    tpu.vector_store %arg8[%c0_19, %c0_20], %30 {strides = array<i32>} : memref<1x1xf32, #tpu.memory_space<vmem>>, vector<1x1xf32>,
    return
  }
  func.func @transform_0(%arg0: i32) -> (i32, i32) {
    %c0_i32 = arith.constant 0 : i32
    %c0_i32_0 = arith.constant 0 : i32
    %c0_i32_1 = arith.constant 0 : i32
    return %c0_i32, %c0_i32_0 : i32, i32
  }
  func.func @transform_1(%arg0: i32) -> (i32, i32) {
    %c0_i32 = arith.constant 0 : i32
    %c0_i32_0 = arith.constant 0 : i32
    %c0_i32_1 = arith.constant 0 : i32
    return %c0_i32, %c0_i32_0 : i32, i32
  }
  func.func @transform_2(%arg0: i32) -> (i32, i32) {
    %c0_i32 = arith.constant 0 : i32
    %c0_i32_0 = arith.constant 0 : i32
    %c0_i32_1 = arith.constant 0 : i32
    return %c0_i32, %c0_i32_0 : i32, i32
  }
  func.func @transform_3(%arg0: i32) -> (i32, i32) {
    %c0_i32 = arith.constant 0 : i32
    %c0_i32_0 = arith.constant 0 : i32
    %c0_i32_1 = arith.constant 0 : i32
    return %c0_i32, %c0_i32_0 : i32, i32
  }
  func.func @transform_4(%arg0: i32) -> (i32, i32) {
    %c0_i32 = arith.constant 0 : i32
    %c0_i32_0 = arith.constant 0 : i32
    %c0_i32_1 = arith.constant 0 : i32
    return %c0_i32, %c0_i32_0 : i32, i32
  }
  func.func @transform_5(%arg0: i32) -> (i32, i32) {
    %c0_i32 = arith.constant 0 : i32
    %c0_i32_0 = arith.constant 0 : i32
    %c0_i32_1 = arith.constant 0 : i32
    return %c0_i32, %c0_i32_0 : i32, i32
  }
  func.func @transform_6(%arg0: i32) -> (i32, i32) {
    %c0_i32 = arith.constant 0 : i32
    %c0_i32_0 = arith.constant 0 : i32
    %c0_i32_1 = arith.constant 0 : i32
    return %c0_i32, %c0_i32_0 : i32, i32
  }
  func.func @transform_7(%arg0: i32) -> (i32, i32) {
    %c0_i32 = arith.constant 0 : i32
    %c0_i32_0 = arith.constant 0 : i32
    %c0_i32_1 = arith.constant 0 : i32
    return %c0_i32, %c0_i32_0 : i32, i32
  }
}

</mosaic_0001>

<bundles_post_ra>
// kernel: tpu_custom_call.1
= control target key start
LH: loop header
LB: loop body
LE: loop exit
PB: predicated region body
PF: predicated region fallthrough
CT: control target
= control target key end

     0   :  { %13 = vsyncpa [#allocation3], 0  ;;  %vm36_vm0 = vcmask 261120   ;;  %s456_s0 = inlined_call_operand.vmem [shape: f32[2,32], index: 0, kind: input, shape index: {}]   ;;  %s457_s1 = inlined_call_operand.vmem [shape: f32[2,128], index: 1, kind: input, shape index: {}]   ;;  %s458_s2 = inlined_call_operand.vmem [shape: f32[32,32], index: 2, kind: input, shape index: {}]   ;;  %s459_s3 = inlined_call_operand.vmem [shape: f32[1,32], index: 3, kind: input, shape index: {}]   ;;  %s460_s4 = inlined_call_operand.vmem [shape: f32[128,32], index: 4, kind: input, shape index: {}]   ;;  %s461_s5 = inlined_call_operand.vmem [shape: f32[1,128], index: 5, kind: input, shape index: {}]   ;;  %s462_s6 = inlined_call_operand.hbm [shape: f32[2,128], index: 6, kind: output, shape index: {0}]   ;;  %s463_s7 = inlined_call_operand.hbm [shape: f32[1,1], index: 7, kind: output, shape index: {1}]  }
   0x1   :  { %v31_v0 = vld [vmem:[%s458_s2 + $0x18] sm:$0xff]  ;;  %v30_v2 = vld [vmem:[%s458_s2 + $0x10] sm:$0xff] }
   0x2   :  { %226 = vmatpush.xpose.msk.msra.mxu0 %vm36_vm0, %v31_v0  ;;  %v88_v1 = vld [vmem:[%s460_s4 + $0x78] sm:$0xff]  ;;  %v87_v3 = vld [vmem:[%s460_s4 + $0x70] sm:$0xff] }
   0x3   :  { %231 = vmatpush.xpose.msk.msra.mxu1 %vm36_vm0, %v88_v1 }
   0x6   :  { %227 = vmatpush.xpose.msk.msra.mxu0 %vm36_vm0, %v30_v2 }
   0x7   :  { %14 = vsyncpa [#allocation5], 0  ;;  %v29_v4 = vld [vmem:[%s458_s2 + $0x8] sm:$0xff]  ;;  %232 = vmatpush.xpose.msk.msra.mxu1 %vm36_vm0, %v87_v3  ;;  %v28_v6 = vld [vmem:[%s458_s2] sm:$0xff]  ;;  %vm165_vm1 = vcmask 1041408   ;;  %s310_s22 = smov [#allocation2]  }
   0x8   :  { %v86_v5 = vld [vmem:[%s460_s4 + $0x68] sm:$0xff]  ;;  %v85_v7 = vld [vmem:[%s460_s4 + $0x60] sm:$0xff]  ;;  %v84_v9 = vld [vmem:[%s460_s4 + $0x58] sm:$0xff]  ;;  %s199_s23 = sshll.u32 %s310_s22, 4  ;;  %s212_s26 = sshll.u32 %s463_s7, 4  ;;  %vm192_vm2 = vcmask 0   ;;  %s200_s23 = int_to_ptr.vmem [resolvable:$true] %s199_s23  ;;  %s213_s26 = int_to_ptr.hbm [resolvable:$true] %s212_s26 }
   0x9   :  { %v27_v8 = vld [vmem:[%s456_s0] sm:$0x3]  ;;  %v83_v10 = vld [vmem:[%s460_s4 + $0x50] sm:$0xff]  ;;  %v82_v11 = vld [vmem:[%s460_s4 + $0x48] sm:$0xff] }
   0xa   :  { %228 = vmatpush.xpose.msk.msra.mxu0 %vm36_vm0, %v29_v4  ;;  %v81_v12 = vld [vmem:[%s460_s4 + $0x40] sm:$0xff]  ;;  %v80_v13 = vld [vmem:[%s460_s4 + $0x38] sm:$0xff]  ;;  %v79_v14 = vld [vmem:[%s460_s4 + $0x30] sm:$0xff] }
   0xb   :  { %233 = vmatpush.xpose.msk.msra.mxu1 %vm36_vm0, %v86_v5  ;;  %v78_v15 = vld [vmem:[%s460_s4 + $0x28] sm:$0xff]  ;;  %v77_v16 = vld [vmem:[%s460_s4 + $0x20] sm:$0xff]  ;;  %v76_v17 = vld [vmem:[%s460_s4 + $0x18] sm:$0xff] }
   0xc   :  { %v75_v18 = vld [vmem:[%s460_s4 + $0x10] sm:$0xff]  ;;  %v74_v19 = vld [vmem:[%s460_s4 + $0x8] sm:$0xff]  ;;  %v73_v20 = vld [vmem:[%s460_s4] sm:$0xff] }
   0xd   :  { %v250_v21 = vld [vmem:[%s459_s3] ss:$0 sm:$0xff] }
   0xe   :  { %229 = vmatpush.xpose.msk.msra.mxu0 %vm36_vm0, %v28_v6  ;;  %v251_v25 = vld [vmem:[%s461_s5] ss:$0 sm:$0xff] }
   0xf   :  { %234 = vmatpush.xpose.msk.msra.mxu1 %vm36_vm0, %v85_v7  ;;  %v178_v27 = vld [vmem:[%s457_s1] sm:$0x3]  ;;  %s201_s1 = sshll.u32 %s462_s6, 4  ;;  %s311_s6 = smov [#allocation4]   ;;  %s202_s1 = int_to_ptr.hbm [resolvable:$true] %s201_s1 }
  0x10   :  { %s210_s0 = sshll.u32 %s311_s6, 4  ;;  %s211_s0 = int_to_ptr.vmem [resolvable:$true] %s210_s0 }
  0x11   :  { %230 = vmatmul.msk.f32.vlgmr.msra.gmra.mxu0 %vm36_vm0, %v27_v8 }
  0x13   :  { %235 = vmatpush.xpose.msk.msra.mxu1 %vm36_vm0, %v84_v9 }
  0x17   :  { %236 = vmatpush.xpose.msk.msra.mxu1 %vm36_vm0, %v83_v10 }
  0x1b   :  { %237 = vmatpush.xpose.msk.msra.mxu1 %vm36_vm0, %v82_v11 }
  0x1f   :  { %238 = vmatpush.xpose.msk.msra.mxu1 %vm36_vm0, %v81_v12 }
  0x23   :  { %239 = vmatpush.xpose.msk.msra.mxu1 %vm36_vm0, %v80_v13 }
  0x27   :  { %240 = vmatpush.xpose.msk.msra.mxu1 %vm36_vm0, %v79_v14 }
  0x2b   :  { %241 = vmatpush.xpose.msk.msra.mxu1 %vm36_vm0, %v78_v15 }
  0x2f   :  { %242 = vmatpush.xpose.msk.msra.mxu1 %vm36_vm0, %v77_v16 }
  0x33   :  { %243 = vmatpush.xpose.msk.msra.mxu1 %vm36_vm0, %v76_v17 }
  0x37   :  { %244 = vmatpush.xpose.msk.msra.mxu1 %vm36_vm0, %v75_v18 }
  0x3b   :  { %245 = vmatpush.xpose.msk.msra.mxu1 %vm36_vm0, %v74_v19 }
  0x3f   :  { %246 = vmatpush.xpose.msk.msra.mxu1 %vm36_vm0, %v73_v20 }
  0x8e   :  { %v69_v22 = vpop.f32.mrf.mxu0 }
  0x8f   :  { %v70_v23 = vadd.f32 %v250_v21, %v69_v22 }
  0x91   :  { %252 = vtanh.f32 %v70_v23 }
  0x97   :  { %v253_v24 = vpop.eup %252 }
  0x98   :  { %247 = vmatmul.msk.f32.vlgmr.msra.gmra.mxu1 %vm36_vm0, %v253_v24 }
 0x115   :  { %v161_v26 = vpop.f32.mrf.mxu1 }
 0x116   :  { %v162_v28 = vadd.f32 %v251_v25, %v161_v26 }
 0x118   :  { %164 = vst [vmem:[#allocation2] sm:$0x3] %v162_v28  ;;  %v166_v29 = vsel %vm165_vm1, %v162_v28, -inf  ;;  %v179_v30 = vmul.f32 %v178_v27, %v162_v28 }
 0x119   :  { %167 = vmax.xlane.f32.xlu0 %v166_v29  ;;  %204 = dma.vmem_to_hbm [thread:$0]  %s200_s23, 32, %s202_s1, [#allocation3]  }
 0x11a   :  { %v180_v31 = vsel %vm165_vm1, %v179_v30, 0.0 }
 0x11b   :  { %181 = vadd.xlane.f32.xlu1 %v180_v31 }
 0x18c   :  { %v168_v32 = vpop.xlane.xlu0 %167 }
 0x18d   :  { %v169_v33 = vsub.f32 %v162_v28, %v168_v32 }
 0x18e   :  { %v182_v41 = vpop.xlane.xlu1 %181 }
 0x18f   :  { %v170_v34 = vmul.f32 1.442695, %v169_v33 }
 0x191   :  { %254 = vpow2.f32 %v170_v34 }
 0x197   :  { %v255_v35 = vpop.eup %254 }
 0x198   :  { %v172_v36 = vsel %vm165_vm1, %v255_v35, 0.0 }
 0x199   :  { %173 = vadd.xlane.f32.xlu0 %v172_v36 }
 0x20c   :  { %v174_v37 = vpop.xlane.xlu0 %173 }
 0x20d   :  { %256 = vlog2.f32 %v174_v37 }
 0x213   :  { %v257_v38 = vpop.eup %256 }
 0x214   :  { %v176_v39 = vmul.f32 0.6931472, %v257_v38 }
 0x216   :  { %v177_v40 = vadd.f32 %v176_v39, %v168_v32 }
 0x218   :  { %v183_v42 = vsub.f32 %v177_v40, %v182_v41 }
 0x21a   :  { %v184_v43 = vsel %vm165_vm1, %v183_v42, 0.0 }
 0x21b   :  { %v185_v44 = vrot.slane %v184_v43, 4 }
 0x21d   :  { %v186_v45 = vadd.f32 %v185_v44, %v184_v43 }
 0x21f   :  { %v187_v46 = vrot.slane %v186_v45, 2 }
 0x221   :  { %v188_v47 = vadd.f32 %v187_v46, %v186_v45 }
 0x223   :  { %v189_v48 = vrot.slane %v188_v47, 1 }
 0x225   :  { %v190_v49 = vadd.f32 %v189_v48, %v188_v47 }
 0x227   :  { %v191_v50 = vmul.f32 0.5, %v190_v49 }
 0x229   :  { %193 = vst.msk [vmem:[#allocation4] sm:$0x1] %vm192_vm2, %v191_v50 }
 0x22a   :  { %215 = dma.vmem_to_hbm [thread:$0]  %s211_s0, 16, %s213_s26, [#allocation5]  }
 0x22b   :  { %306 = dma.done.wait [#allocation3], 32  }
 0x22c   :  { %307 = vsyncadd [#allocation3], 4294967264 }
 0x22d   :  { %308 = dma.done.wait [#allocation5], 16  }
 0x22e   :  { %309 = vsyncadd [#allocation5], 4294967280 }
 0x22f   :  { %224 = vsyncpa [#allocation3], 1 }
 0x230   :  { %225 = vsyncpa [#allocation5], 1 }

</bundles_post_ra>
